<compile_context>
chip_gen: v7x
topology: tpu7x:2x2x1
jax: 0.10.0
libtpu: 0.0.40
codegen_flags: <defaults>
</compile_context>

<pallas_src>
import jax
import jax.numpy as jnp
import numpy as np
from jax.experimental import pallas as pl
from jax.experimental.pallas import tpu as pltpu


# ----------------------------------------------------------------------------
# Pallas kernels (all work in (channels, voxels) layout: voxels on lanes)
# ----------------------------------------------------------------------------
def _stage_a_kernel(xl_ref, fp_ref, wg1_ref, wx1_ref, b1_ref, pw1_ref, pb1_ref,
                    o_ref):
    """xl_att = xl * sigmoid(psi1(relu(Wg1 @ fp + Wx1 @ xl + b)))."""
    xl = xl_ref[0]                                                # (Cl, tP)
    h = jnp.dot(wg1_ref[...], fp_ref[0], preferred_element_type=jnp.float32)
    h = h + jnp.dot(wx1_ref[...], xl, preferred_element_type=jnp.float32)
    h = jnp.maximum(h + b1_ref[...], 0.0)                         # (Cl, tP)
    s = jnp.sum(h * pw1_ref[...], axis=0, keepdims=True) + pb1_ref[...]
    a1 = jax.nn.sigmoid(s)                                        # (1, tP)
    o_ref[0] = (xl * a1).astype(o_ref.dtype)


def _stage_b_kernel(xg_ref, xp_ref, wg2_ref, wx2_ref, b2_ref, pw2_ref, pb2_ref,
                    o_ref):
    """a2 = sigmoid(psi2(relu(Wg2 @ xg + Wx2 @ xl_att_patches + b)))."""
    h = jnp.dot(wg2_ref[...], xg_ref[0], preferred_element_type=jnp.float32)
    h = h + jnp.dot(wx2_ref[...], xp_ref[0], preferred_element_type=jnp.float32)
    h = jnp.maximum(h + b2_ref[...], 0.0)                         # (Cg, tP2)
    s = jnp.sum(h * pw2_ref[...], axis=0, keepdims=True) + pb2_ref[...]
    o_ref[0] = jax.nn.sigmoid(s).astype(o_ref.dtype)              # (1, tP2)


def _stage_c_kernel(a2_ref, ud_ref, m2_ref, xl_ref, o_ref):
    """out = xl_att * trilinear_up(a2); upsample = U_D @ a2 @ kron(U_H,U_W)^T."""
    t = jnp.dot(ud_ref[...], a2_ref[0],
                preferred_element_type=jnp.float32)               # (tD, Hg*Wg)
    att = jnp.dot(t, m2_ref[...],
                  preferred_element_type=jnp.float32)             # (tD, H*W)
    o_ref[0] = (xl_ref[0] * att[None, :, :]).astype(o_ref.dtype)


# ----------------------------------------------------------------------------
# pallas_call wrappers
# ----------------------------------------------------------------------------
_CPARAMS = pltpu.CompilerParams(
    dimension_semantics=("parallel", "parallel"),
    vmem_limit_bytes=32 * 1024 * 1024)


def _pick_tile(P, max_tile=2048):
    """Largest lane-axis tile: full axis if it fits, else the biggest
    128-multiple divisor of P <= max_tile (falls back to the full axis)."""
    if P <= max_tile:
        return P
    t = (max_tile // 128) * 128
    while t >= 128:
        if P % t == 0:
            return t
        t -= 128
    return P


def _pick_d_tile(D, hw, c, max_bytes=4 * 1024 * 1024):
    """Largest tD dividing D keeping the (c, tD, hw) f32 block under budget;
    tD must equal D or be a multiple of 8 (sublane constraint)."""
    if D * hw * c * 4 <= max_bytes:
        return D
    t = D - (D % 8)
    while t >= 8:
        if D % t == 0 and t * hw * c * 4 <= max_bytes:
            return t
        t -= 8
    return D


def _full2d(shape):
    return pl.BlockSpec(shape, lambda b, i: (0, 0))


def _stage_a(xl, fp, wg1m, wx1m, b1, pw1, pb1):
    B, Cl, P = xl.shape
    Kf = fp.shape[1]
    t = _pick_tile(P)
    return pl.pallas_call(
        _stage_a_kernel,
        out_shape=jax.ShapeDtypeStruct((B, Cl, P), xl.dtype),
        grid=(B, P // t),
        in_specs=[
            pl.BlockSpec((1, Cl, t), lambda b, i: (b, 0, i)),
            pl.BlockSpec((1, Kf, t), lambda b, i: (b, 0, i)),
            _full2d((Cl, Kf)), _full2d((Cl, Cl)), _full2d((Cl, 1)),
            _full2d((Cl, 1)), _full2d((1, 1)),
        ],
        out_specs=pl.BlockSpec((1, Cl, t), lambda b, i: (b, 0, i)),
        compiler_params=_CPARAMS,
    )(xl, fp, wg1m, wx1m, b1, pw1, pb1)


def _stage_b(xg, xp, wg2m, wx2m, b2, pw2, pb2):
    B, Cg, P2 = xg.shape
    Kx = xp.shape[1]
    t = _pick_tile(P2)
    return pl.pallas_call(
        _stage_b_kernel,
        out_shape=jax.ShapeDtypeStruct((B, 1, P2), xg.dtype),
        grid=(B, P2 // t),
        in_specs=[
            pl.BlockSpec((1, Cg, t), lambda b, i: (b, 0, i)),
            pl.BlockSpec((1, Kx, t), lambda b, i: (b, 0, i)),
            _full2d((Cg, Cg)), _full2d((Cg, Kx)), _full2d((Cg, 1)),
            _full2d((Cg, 1)), _full2d((1, 1)),
        ],
        out_specs=pl.BlockSpec((1, 1, t), lambda b, i: (b, 0, i)),
        compiler_params=_CPARAMS,
    )(xg, xp, wg2m, wx2m, b2, pw2, pb2)


def _stage_c(a2p, udp, m2, xl4):
    B, Cl, D, HW = xl4.shape
    Dg_p, HgWg = a2p.shape[1], a2p.shape[2]
    tD = _pick_d_tile(D, HW, Cl)
    return pl.pallas_call(
        _stage_c_kernel,
        out_shape=jax.ShapeDtypeStruct((B, Cl, D, HW), xl4.dtype),
        grid=(B, D // tD),
        in_specs=[
            pl.BlockSpec((1, Dg_p, HgWg), lambda b, i: (b, 0, 0)),
            pl.BlockSpec((tD, Dg_p), lambda b, i: (i, 0)),
            pl.BlockSpec((HgWg, HW), lambda b, i: (0, 0)),
            pl.BlockSpec((1, Cl, tD, HW), lambda b, i: (b, 0, i, 0)),
        ],
        out_specs=pl.BlockSpec((1, Cl, tD, HW), lambda b, i: (b, 0, i, 0)),
        compiler_params=_CPARAMS,
    )(a2p, udp, m2, xl4)


# ----------------------------------------------------------------------------
# JAX glue: patch extraction (kernel == stride convs) and upsample matrices
# ----------------------------------------------------------------------------
def _space_to_depth_cf(x, k):
    # (B, C, k*D, k*H, k*W) -> (B, C*k^3, D*H*W), row order (c, kd, kh, kw)
    B, C, Dk, Hk, Wk = x.shape
    D, H, W = Dk // k, Hk // k, Wk // k
    x = x.reshape(B, C, D, k, H, k, W, k)
    x = jnp.transpose(x, (0, 1, 3, 5, 7, 2, 4, 6))
    return x.reshape(B, C * k * k * k, D * H * W)


def _upsample_matrix(n_in, n_out):
    # PyTorch trilinear, align_corners=False (half-pixel, clamped), (n_out, n_in).
    o = jnp.arange(n_out, dtype=jnp.float32)
    src = jnp.maximum((o + 0.5) * (n_in / n_out) - 0.5, 0.0)
    i0 = jnp.clip(jnp.floor(src).astype(jnp.int32), 0, n_in - 1)
    i1 = jnp.minimum(i0 + 1, n_in - 1)
    w1 = src - i0.astype(jnp.float32)
    rows = jnp.arange(n_out)
    m = jnp.zeros((n_out, n_in), jnp.float32)
    m = m.at[rows, i0].add(1.0 - w1)
    m = m.at[rows, i1].add(w1)
    return m


def _interp_axis(arr, axis, s_out):
    # Reference-side trilinear interpolation along one axis (half-pixel, clamp).
    s_in = arr.shape[axis]
    scale = s_in / s_out
    o = jnp.arange(s_out, dtype=jnp.float32)
    src = jnp.maximum((o + 0.5) * scale - 0.5, 0.0)
    i0 = jnp.clip(jnp.floor(src).astype(jnp.int32), 0, s_in - 1)
    i1 = jnp.minimum(i0 + 1, s_in - 1)
    w1 = src - i0.astype(jnp.float32)
    w0 = 1.0 - w1
    a0 = jnp.take(arr, i0, axis=axis)
    a1 = jnp.take(arr, i1, axis=axis)
    bshape = [1] * arr.ndim
    bshape[axis] = s_out
    return a0 * w0.reshape(bshape) + a1 * w1.reshape(bshape)


# ----------------------------------------------------------------------------
# Full forward pass (Pallas path) and a pure-JAX reference
# ----------------------------------------------------------------------------
def attention_block_pallas(x_l, x_g, first_layer_f, p):
    B, Cl, D, H, W = x_l.shape
    Cg = x_g.shape[1]
    Ci = first_layer_f.shape[1]
    sg = Cl // Ci            # W_g1 kernel/stride
    sx = Cg // Cl            # W_x2 kernel/stride
    # The PyTorch module's padding (ratio // 2 - 1) must be 0 => ratio == 2.
    assert sg == 2 and sx == 2, "only channel ratios of 2 (padding 0) supported"
    Dg, Hg, Wg = D // sx, H // sx, W // sx
    assert x_g.shape[2:] == (Dg, Hg, Wg)

    P = D * H * W
    P2 = Dg * Hg * Wg

    # --- stage A: first attention gate (voxels on the 128-lane axis) -------
    xl = x_l.reshape(B, Cl, P)
    # TODO(synk): fold this kernel==stride patch extraction into the stage-A
    # in_spec (strided DMA) instead of materializing it via an XLA transpose.
    fp = _space_to_depth_cf(first_layer_f, sg)          # (B, sg^3*Ci, P)
    wg1m = p['wg1'].reshape(Cl, -1)
    wx1m = p['wx1'].reshape(Cl, Cl)
    b1 = (p['bg1'] + p['bx1']).reshape(Cl, 1)
    pw1 = p['wpsi1'].reshape(Cl, 1)
    pb1 = p['bpsi1'].reshape(1, 1)
    xl_att = _stage_a(xl, fp, wg1m, wx1m, b1, pw1, pb1)  # (B, Cl, P)

    # --- stage B: second attention map at half resolution ------------------
    xg = x_g.reshape(B, Cg, P2)
    xp = _space_to_depth_cf(xl_att.reshape(B, Cl, D, H, W), sx)  # (B, sx^3*Cl, P2)
    wg2m = p['wg2'].reshape(Cg, Cg)
    wx2m = p['wx2'].reshape(Cg, -1)
    b2 = (p['bg2'] + p['bx2']).reshape(Cg, 1)
    pw2 = p['wpsi2'].reshape(Cg, 1)
    pb2 = p['bpsi2'].reshape(1, 1)
    a2 = _stage_b(xg, xp, wg2m, wx2m, b2, pw2, pb2)      # (B, 1, P2)

    # --- stage C: fused trilinear 2x upsample + final gating ---------------
    # Upsample is expressed as small dense interpolation matrices so the
    # full-resolution attention map is produced inside the kernel and never
    # round-trips HBM.
    u_d = _upsample_matrix(Dg, D)                        # (D, Dg)
    u_h = _upsample_matrix(Hg, H)                        # (H, Hg)
    u_w = _upsample_matrix(Wg, W)                        # (W, Wg)
    m2 = jnp.kron(u_h.T, u_w.T)                          # (Hg*Wg, H*W)
    # TODO(synk): for large H*W use the separable (U_H, U_W) two-matmul form;
    # the kron matrix grows as (H*W)^2 / 4.
    dg_p = ((Dg + 7) // 8) * 8                           # pad contraction dim to >= 8
    a2p = jnp.pad(a2.reshape(B, Dg, Hg * Wg), ((0, 0), (0, dg_p - Dg), (0, 0)))
    udp = jnp.pad(u_d, ((0, 0), (0, dg_p - Dg)))

    out4 = _stage_c(a2p, udp, m2, xl_att.reshape(B, Cl, D, H * W))
    return out4.reshape(B, Cl, D, H, W)                  # already NCDHW


def attention_block_reference(x_l, x_g, first_layer_f, p):
    """Pure-JAX reference using lax.conv_general_dilated (NCDHW)."""
    def conv(x, w, b, stride):
        y = jax.lax.conv_general_dilated(
            x, w, window_strides=(stride,) * 3, padding='VALID',
            dimension_numbers=('NCDHW', 'OIDHW', 'NCDHW'),
            precision=jax.lax.Precision.HIGHEST)
        return y + b.reshape(1, -1, 1, 1, 1)

    sg = p['wg1'].shape[2]
    sx = p['wx2'].shape[2]
    g1 = conv(first_layer_f, p['wg1'], p['bg1'], sg)
    x1 = conv(x_l, p['wx1'], p['bx1'], 1)
    a1 = jax.nn.sigmoid(conv(jnp.maximum(g1 + x1, 0.0), p['wpsi1'], p['bpsi1'], 1))
    xla = x_l * a1
    g2 = conv(x_g, p['wg2'], p['bg2'], 1)
    x2 = conv(xla, p['wx2'], p['bx2'], sx)
    a2 = jax.nn.sigmoid(conv(jnp.maximum(g2 + x2, 0.0), p['wpsi2'], p['bpsi2'], 1))
    a2_up = a2
    for axis, s_out in zip((2, 3, 4), x_l.shape[2:]):
        a2_up = _interp_axis(a2_up, axis, s_out)
    return xla * a2_up


# ----------------------------------------------------------------------------
# Deterministic parameter init (PyTorch Conv3d default-style uniform)
# ----------------------------------------------------------------------------
def init_params(key, channel_l, channel_g, init_channel):
    def conv_init(k, out_c, in_c, ks):
        fan_in = in_c * ks ** 3
        bound = 1.0 / (fan_in ** 0.5)
        kw, kb = jax.random.split(k)
        w = jax.random.uniform(kw, (out_c, in_c, ks, ks, ks), jnp.float32,
                               -bound, bound)
        b = jax.random.uniform(kb, (out_c,), jnp.float32, -bound, bound)
        return w, b

    keys = jax.random.split(key, 6)
    sx = channel_g // channel_l
    sg = channel_l // init_channel
    p = {}
    p['wx1'], p['bx1'] = conv_init(keys[0], channel_l, channel_l, 1)
    p['wx2'], p['bx2'] = conv_init(keys[1], channel_g, channel_l, sx)
    p['wg1'], p['bg1'] = conv_init(keys[2], channel_l, init_channel, sg)
    p['wg2'], p['bg2'] = conv_init(keys[3], channel_g, channel_g, 1)
    p['wpsi1'], p['bpsi1'] = conv_init(keys[4], 1, channel_l, 1)
    p['wpsi2'], p['bpsi2'] = conv_init(keys[5], 1, channel_g, 1)
    return p


# ----------------------------------------------------------------------------
if __name__ == "__main__":
    key = jax.random.PRNGKey(0)
    B = 2
    init_channel, channel_l, channel_g = 4, 8, 16   # ratios of 2 => padding 0
    D = H = W = 8

    k1, k2, k3, kp = jax.random.split(key, 4)
    x_l = jax.random.normal(k1, (B, channel_l, D, H, W), jnp.float32)
    x_g = jax.random.normal(k2, (B, channel_g, D // 2, H // 2, W // 2),
                            jnp.float32)
    first_layer_f = jax.random.normal(k3, (B, init_channel, 2 * D, 2 * H, 2 * W),
                                      jnp.float32)
    params = init_params(kp, channel_l, channel_g, init_channel)

    fwd = jax.jit(attention_block_pallas)
    out = jax.block_until_ready(fwd(x_l, x_g, first_layer_f, params))

    ref = attention_block_reference(x_l, x_g, first_layer_f, params)
    np.testing.assert_allclose(np.asarray(out), np.asarray(ref),
                               rtol=2e-2, atol=2e-2)
    print("KERNEL_OK")
</pallas_src>

<mosaic_0001>
module attributes {stable_mosaic.version = 11 : i64} {
  func.func @_stage_a_kernel(%arg0: i32, %arg1: i32, %arg2: memref<1x8x512xf32, #tpu.memory_space<vmem>>, %arg3: memref<1x32x512xf32, #tpu.memory_space<vmem>>, %arg4: memref<8x32xf32, #tpu.memory_space<vmem>>, %arg5: memref<8x8xf32, #tpu.memory_space<vmem>>, %arg6: memref<8x1xf32, #tpu.memory_space<vmem>>, %arg7: memref<8x1xf32, #tpu.memory_space<vmem>>, %arg8: memref<1x1xf32, #tpu.memory_space<vmem>>, %arg9: memref<1x8x512xf32, #tpu.memory_space<vmem>>) attributes {dimension_semantics = [#tpu.dimension_semantics<parallel>, #tpu.dimension_semantics<parallel>], iteration_bounds = array<i64: 2, 1>, scalar_prefetch = 0 : i64, scratch_operands = 0 : i64, tpu.core_type = #tpu.core_type<tc>, window_params = [{transform_indices = @transform_0, window_bounds = array<i64: 1, 8, 512>}, {transform_indices = @transform_1, window_bounds = array<i64: 1, 32, 512>}, {pipeline_mode = #tpu.pipeline_mode<synchronous>, transform_indices = @transform_2, window_bounds = array<i64: 8, 32>}, {pipeline_mode = #tpu.pipeline_mode<synchronous>, transform_indices = @transform_3, window_bounds = array<i64: 8, 8>}, {pipeline_mode = #tpu.pipeline_mode<synchronous>, transform_indices = @transform_4, window_bounds = array<i64: 8, 1>}, {pipeline_mode = #tpu.pipeline_mode<synchronous>, transform_indices = @transform_5, window_bounds = array<i64: 8, 1>}, {pipeline_mode = #tpu.pipeline_mode<synchronous>, transform_indices = @transform_6, window_bounds = array<i64: 1, 1>}, {transform_indices = @transform_7, window_bounds = array<i64: 1, 8, 512>}]} {
    %c0 = arith.constant 0 : index
    %c0_0 = arith.constant 0 : index
    %c0_1 = arith.constant 0 : index
    %0 = vector.load %arg2[%c0, %c0_0, %c0_1] : memref<1x8x512xf32, #tpu.memory_space<vmem>>, vector<1x8x512xf32>
    %1 = vector.shape_cast %0 : vector<1x8x512xf32> to vector<8x512xf32>
    %c0_2 = arith.constant 0 : index
    %c0_3 = arith.constant 0 : index
    %2 = vector.load %arg4[%c0_2, %c0_3] : memref<8x32xf32, #tpu.memory_space<vmem>>, vector<8x32xf32>
    %c0_4 = arith.constant 0 : index
    %c0_5 = arith.constant 0 : index
    %c0_6 = arith.constant 0 : index
    %3 = vector.load %arg3[%c0_4, %c0_5, %c0_6] : memref<1x32x512xf32, #tpu.memory_space<vmem>>, vector<1x32x512xf32>
    %4 = vector.shape_cast %3 : vector<1x32x512xf32> to vector<32x512xf32>
    %cst = arith.constant dense<0.000000e+00> : vector<8x512xf32>
    %5 = tpu.matmul %2, %4, %cst {dimension_numbers = #tpu.dot_dimension_numbers<[1], [0], [0], [1], [0, 0, 1, 1], [], []>} : vector<8x32xf32>, vector<32x512xf32>, vector<8x512xf32> -> vector<8x512xf32>
    %c0_7 = arith.constant 0 : index
    %c0_8 = arith.constant 0 : index
    %6 = vector.load %arg5[%c0_7, %c0_8] : memref<8x8xf32, #tpu.memory_space<vmem>>, vector<8x8xf32>
    %cst_9 = arith.constant dense<0.000000e+00> : vector<8x512xf32>
    %7 = tpu.matmul %6, %1, %cst_9 {dimension_numbers = #tpu.dot_dimension_numbers<[1], [0], [0], [1], [0, 0, 1, 1], [], []>} : vector<8x8xf32>, vector<8x512xf32>, vector<8x512xf32> -> vector<8x512xf32>
    %8 = arith.addf %5, %7 : vector<8x512xf32>
    %c0_10 = arith.constant 0 : index
    %c0_11 = arith.constant 0 : index
    %9 = vector.load %arg6[%c0_10, %c0_11] : memref<8x1xf32, #tpu.memory_space<vmem>>, vector<8x1xf32>
    %10 = vector.broadcast %9 : vector<8x1xf32> to vector<8x512xf32>
    %11 = arith.addf %8, %10 : vector<8x512xf32>
    %cst_12 = arith.constant 0.000000e+00 : f32
    %12 = vector.broadcast %cst_12 : f32 to vector<8x512xf32>
    %13 = arith.maximumf %11, %12 : vector<8x512xf32>
    %c0_13 = arith.constant 0 : index
    %c0_14 = arith.constant 0 : index
    %14 = vector.load %arg7[%c0_13, %c0_14] : memref<8x1xf32, #tpu.memory_space<vmem>>, vector<8x1xf32>
    %15 = vector.broadcast %14 : vector<8x1xf32> to vector<8x512xf32>
    %16 = arith.mulf %13, %15 : vector<8x512xf32>
    %cst_15 = arith.constant dense<0.000000e+00> : vector<512xf32>
    %17 = vector.multi_reduction <add>, %16, %cst_15 [0] : vector<8x512xf32> to vector<512xf32>
    %18 = vector.shape_cast %17 : vector<512xf32> to vector<1x512xf32>
    %c0_16 = arith.constant 0 : index
    %c0_17 = arith.constant 0 : index
    %19 = vector.load %arg8[%c0_16, %c0_17] : memref<1x1xf32, #tpu.memory_space<vmem>>, vector<1x1xf32>
    %20 = vector.broadcast %19 : vector<1x1xf32> to vector<1x512xf32>
    %21 = arith.addf %18, %20 : vector<1x512xf32>
    %22 = arith.negf %21 : vector<1x512xf32>
    %23 = math.exp %22 : vector<1x512xf32>
    %cst_18 = arith.constant 1.000000e+00 : f32
    %24 = vector.broadcast %cst_18 : f32 to vector<1x512xf32>
    %25 = arith.addf %24, %23 : vector<1x512xf32>
    %26 = arith.divf %24, %25 : vector<1x512xf32>
    %27 = vector.broadcast %26 : vector<1x512xf32> to vector<8x512xf32>
    %28 = arith.mulf %1, %27 : vector<8x512xf32>
    %c0_19 = arith.constant 0 : index
    %c0_20 = arith.constant 0 : index
    %c0_21 = arith.constant 0 : index
    %29 = vector.load %arg9[%c0_19, %c0_20, %c0_21] : memref<1x8x512xf32, #tpu.memory_space<vmem>>, vector<1x8x512xf32>
    %30 = vector.shape_cast %29 : vector<1x8x512xf32> to vector<8x512xf32>
    %31 = vector.shape_cast %28 : vector<8x512xf32> to vector<1x8x512xf32>
    tpu.vector_store %arg9[%c0_19, %c0_20, %c0_21], %31 {strides = array<i32>} : memref<1x8x512xf32, #tpu.memory_space<vmem>>, vector<1x8x512xf32>,
    return
  }
  func.func @transform_0(%arg0: i32, %arg1: i32) -> (i32, i32, i32) {
    %c0_i32 = arith.constant 0 : i32
    %c0_i32_0 = arith.constant 0 : i32
    return %arg0, %c0_i32, %arg1 : i32, i32, i32
  }
  func.func @transform_1(%arg0: i32, %arg1: i32) -> (i32, i32, i32) {
    %c0_i32 = arith.constant 0 : i32
    %c0_i32_0 = arith.constant 0 : i32
    return %arg0, %c0_i32, %arg1 : i32, i32, i32
  }
  func.func @transform_2(%arg0: i32, %arg1: i32) -> (i32, i32) {
    %c0_i32 = arith.constant 0 : i32
    %c0_i32_0 = arith.constant 0 : i32
    %c0_i32_1 = arith.constant 0 : i32
    return %c0_i32, %c0_i32_0 : i32, i32
  }
  func.func @transform_3(%arg0: i32, %arg1: i32) -> (i32, i32) {
    %c0_i32 = arith.constant 0 : i32
    %c0_i32_0 = arith.constant 0 : i32
    %c0_i32_1 = arith.constant 0 : i32
    return %c0_i32, %c0_i32_0 : i32, i32
  }
  func.func @transform_4(%arg0: i32, %arg1: i32) -> (i32, i32) {
    %c0_i32 = arith.constant 0 : i32
    %c0_i32_0 = arith.constant 0 : i32
    %c0_i32_1 = arith.constant 0 : i32
    return %c0_i32, %c0_i32_0 : i32, i32
  }
  func.func @transform_5(%arg0: i32, %arg1: i32) -> (i32, i32) {
    %c0_i32 = arith.constant 0 : i32
    %c0_i32_0 = arith.constant 0 : i32
    %c0_i32_1 = arith.constant 0 : i32
    return %c0_i32, %c0_i32_0 : i32, i32
  }
  func.func @transform_6(%arg0: i32, %arg1: i32) -> (i32, i32) {
    %c0_i32 = arith.constant 0 : i32
    %c0_i32_0 = arith.constant 0 : i32
    %c0_i32_1 = arith.constant 0 : i32
    return %c0_i32, %c0_i32_0 : i32, i32
  }
  func.func @transform_7(%arg0: i32, %arg1: i32) -> (i32, i32, i32) {
    %c0_i32 = arith.constant 0 : i32
    %c0_i32_0 = arith.constant 0 : i32
    return %arg0, %c0_i32, %arg1 : i32, i32, i32
  }
}

module attributes {stable_mosaic.version = 11 : i64} {
  func.func @_stage_b_kernel(%arg0: i32, %arg1: i32, %arg2: memref<1x16x64xf32, #tpu.memory_space<vmem>>, %arg3: memref<1x64x64xf32, #tpu.memory_space<vmem>>, %arg4: memref<16x16xf32, #tpu.memory_space<vmem>>, %arg5: memref<16x64xf32, #tpu.memory_space<vmem>>, %arg6: memref<16x1xf32, #tpu.memory_space<vmem>>, %arg7: memref<16x1xf32, #tpu.memory_space<vmem>>, %arg8: memref<1x1xf32, #tpu.memory_space<vmem>>, %arg9: memref<1x1x64xf32, #tpu.memory_space<vmem>>) attributes {dimension_semantics = [#tpu.dimension_semantics<parallel>, #tpu.dimension_semantics<parallel>], iteration_bounds = array<i64: 2, 1>, scalar_prefetch = 0 : i64, scratch_operands = 0 : i64, tpu.core_type = #tpu.core_type<tc>, window_params = [{transform_indices = @transform_0, window_bounds = array<i64: 1, 16, 64>}, {transform_indices = @transform_1, window_bounds = array<i64: 1, 64, 64>}, {pipeline_mode = #tpu.pipeline_mode<synchronous>, transform_indices = @transform_2, window_bounds = array<i64: 16, 16>}, {pipeline_mode = #tpu.pipeline_mode<synchronous>, transform_indices = @transform_3, window_bounds = array<i64: 16, 64>}, {pipeline_mode = #tpu.pipeline_mode<synchronous>, transform_indices = @transform_4, window_bounds = array<i64: 16, 1>}, {pipeline_mode = #tpu.pipeline_mode<synchronous>, transform_indices = @transform_5, window_bounds = array<i64: 16, 1>}, {pipeline_mode = #tpu.pipeline_mode<synchronous>, transform_indices = @transform_6, window_bounds = array<i64: 1, 1>}, {transform_indices = @transform_7, window_bounds = array<i64: 1, 1, 64>}]} {
    %c0 = arith.constant 0 : index
    %c0_0 = arith.constant 0 : index
    %0 = vector.load %arg4[%c0, %c0_0] : memref<16x16xf32, #tpu.memory_space<vmem>>, vector<16x16xf32>
    %c0_1 = arith.constant 0 : index
    %c0_2 = arith.constant 0 : index
    %c0_3 = arith.constant 0 : index
    %1 = vector.load %arg2[%c0_1, %c0_2, %c0_3] : memref<1x16x64xf32, #tpu.memory_space<vmem>>, vector<1x16x64xf32>
    %2 = vector.shape_cast %1 : vector<1x16x64xf32> to vector<16x64xf32>
    %cst = arith.constant dense<0.000000e+00> : vector<16x64xf32>
    %3 = tpu.matmul %0, %2, %cst {dimension_numbers = #tpu.dot_dimension_numbers<[1], [0], [0], [1], [0, 0, 1, 1], [], []>} : vector<16x16xf32>, vector<16x64xf32>, vector<16x64xf32> -> vector<16x64xf32>
    %c0_4 = arith.constant 0 : index
    %c0_5 = arith.constant 0 : index
    %4 = vector.load %arg5[%c0_4, %c0_5] : memref<16x64xf32, #tpu.memory_space<vmem>>, vector<16x64xf32>
    %c0_6 = arith.constant 0 : index
    %c0_7 = arith.constant 0 : index
    %c0_8 = arith.constant 0 : index
    %5 = vector.load %arg3[%c0_6, %c0_7, %c0_8] : memref<1x64x64xf32, #tpu.memory_space<vmem>>, vector<1x64x64xf32>
    %6 = vector.shape_cast %5 : vector<1x64x64xf32> to vector<64x64xf32>
    %cst_9 = arith.constant dense<0.000000e+00> : vector<16x64xf32>
    %7 = tpu.matmul %4, %6, %cst_9 {dimension_numbers = #tpu.dot_dimension_numbers<[1], [0], [0], [1], [0, 0, 1, 1], [], []>} : vector<16x64xf32>, vector<64x64xf32>, vector<16x64xf32> -> vector<16x64xf32>
    %8 = arith.addf %3, %7 : vector<16x64xf32>
    %c0_10 = arith.constant 0 : index
    %c0_11 = arith.constant 0 : index
    %9 = vector.load %arg6[%c0_10, %c0_11] : memref<16x1xf32, #tpu.memory_space<vmem>>, vector<16x1xf32>
    %10 = vector.broadcast %9 : vector<16x1xf32> to vector<16x64xf32>
    %11 = arith.addf %8, %10 : vector<16x64xf32>
    %cst_12 = arith.constant 0.000000e+00 : f32
    %12 = vector.broadcast %cst_12 : f32 to vector<16x64xf32>
    %13 = arith.maximumf %11, %12 : vector<16x64xf32>
    %c0_13 = arith.constant 0 : index
    %c0_14 = arith.constant 0 : index
    %14 = vector.load %arg7[%c0_13, %c0_14] : memref<16x1xf32, #tpu.memory_space<vmem>>, vector<16x1xf32>
    %15 = vector.broadcast %14 : vector<16x1xf32> to vector<16x64xf32>
    %16 = arith.mulf %13, %15 : vector<16x64xf32>
    %cst_15 = arith.constant dense<0.000000e+00> : vector<64xf32>
    %17 = vector.multi_reduction <add>, %16, %cst_15 [0] : vector<16x64xf32> to vector<64xf32>
    %18 = vector.shape_cast %17 : vector<64xf32> to vector<1x64xf32>
    %c0_16 = arith.constant 0 : index
    %c0_17 = arith.constant 0 : index
    %19 = vector.load %arg8[%c0_16, %c0_17] : memref<1x1xf32, #tpu.memory_space<vmem>>, vector<1x1xf32>
    %20 = vector.broadcast %19 : vector<1x1xf32> to vector<1x64xf32>
    %21 = arith.addf %18, %20 : vector<1x64xf32>
    %22 = arith.negf %21 : vector<1x64xf32>
    %23 = math.exp %22 : vector<1x64xf32>
    %cst_18 = arith.constant 1.000000e+00 : f32
    %24 = vector.broadcast %cst_18 : f32 to vector<1x64xf32>
    %25 = arith.addf %24, %23 : vector<1x64xf32>
    %26 = arith.divf %24, %25 : vector<1x64xf32>
    %c0_19 = arith.constant 0 : index
    %c0_20 = arith.constant 0 : index
    %c0_21 = arith.constant 0 : index
    %27 = vector.load %arg9[%c0_19, %c0_20, %c0_21] : memref<1x1x64xf32, #tpu.memory_space<vmem>>, vector<1x1x64xf32>
    %28 = vector.shape_cast %27 : vector<1x1x64xf32> to vector<1x64xf32>
    %29 = vector.shape_cast %26 : vector<1x64xf32> to vector<1x1x64xf32>
    tpu.vector_store %arg9[%c0_19, %c0_20, %c0_21], %29 {strides = array<i32>} : memref<1x1x64xf32, #tpu.memory_space<vmem>>, vector<1x1x64xf32>,
    return
  }
  func.func @transform_0(%arg0: i32, %arg1: i32) -> (i32, i32, i32) {
    %c0_i32 = arith.constant 0 : i32
    %c0_i32_0 = arith.constant 0 : i32
    return %arg0, %c0_i32, %arg1 : i32, i32, i32
  }
  func.func @transform_1(%arg0: i32, %arg1: i32) -> (i32, i32, i32) {
    %c0_i32 = arith.constant 0 : i32
    %c0_i32_0 = arith.constant 0 : i32
    return %arg0, %c0_i32, %arg1 : i32, i32, i32
  }
  func.func @transform_2(%arg0: i32, %arg1: i32) -> (i32, i32) {
    %c0_i32 = arith.constant 0 : i32
    %c0_i32_0 = arith.constant 0 : i32
    %c0_i32_1 = arith.constant 0 : i32
    return %c0_i32, %c0_i32_0 : i32, i32
  }
  func.func @transform_3(%arg0: i32, %arg1: i32) -> (i32, i32) {
    %c0_i32 = arith.constant 0 : i32
    %c0_i32_0 = arith.constant 0 : i32
    %c0_i32_1 = arith.constant 0 : i32
    return %c0_i32, %c0_i32_0 : i32, i32
  }
  func.func @transform_4(%arg0: i32, %arg1: i32) -> (i32, i32) {
    %c0_i32 = arith.constant 0 : i32
    %c0_i32_0 = arith.constant 0 : i32
    %c0_i32_1 = arith.constant 0 : i32
    return %c0_i32, %c0_i32_0 : i32, i32
  }
  func.func @transform_5(%arg0: i32, %arg1: i32) -> (i32, i32) {
    %c0_i32 = arith.constant 0 : i32
    %c0_i32_0 = arith.constant 0 : i32
    %c0_i32_1 = arith.constant 0 : i32
    return %c0_i32, %c0_i32_0 : i32, i32
  }
  func.func @transform_6(%arg0: i32, %arg1: i32) -> (i32, i32) {
    %c0_i32 = arith.constant 0 : i32
    %c0_i32_0 = arith.constant 0 : i32
    %c0_i32_1 = arith.constant 0 : i32
    return %c0_i32, %c0_i32_0 : i32, i32
  }
  func.func @transform_7(%arg0: i32, %arg1: i32) -> (i32, i32, i32) {
    %c0_i32 = arith.constant 0 : i32
    %c0_i32_0 = arith.constant 0 : i32
    return %arg0, %c0_i32, %arg1 : i32, i32, i32
  }
}

module attributes {stable_mosaic.version = 11 : i64} {
  func.func @_stage_c_kernel(%arg0: i32, %arg1: i32, %arg2: memref<1x8x16xf32, #tpu.memory_space<vmem>>, %arg3: memref<8x8xf32, #tpu.memory_space<vmem>>, %arg4: memref<16x64xf32, #tpu.memory_space<vmem>>, %arg5: memref<1x8x8x64xf32, #tpu.memory_space<vmem>>, %arg6: memref<1x8x8x64xf32, #tpu.memory_space<vmem>>) attributes {dimension_semantics = [#tpu.dimension_semantics<parallel>, #tpu.dimension_semantics<parallel>], iteration_bounds = array<i64: 2, 1>, scalar_prefetch = 0 : i64, scratch_operands = 0 : i64, tpu.core_type = #tpu.core_type<tc>, window_params = [{transform_indices = @transform_0, window_bounds = array<i64: 1, 8, 16>}, {transform_indices = @transform_1, window_bounds = array<i64: 8, 8>}, {pipeline_mode = #tpu.pipeline_mode<synchronous>, transform_indices = @transform_2, window_bounds = array<i64: 16, 64>}, {transform_indices = @transform_3, window_bounds = array<i64: 1, 8, 8, 64>}, {transform_indices = @transform_4, window_bounds = array<i64: 1, 8, 8, 64>}]} {
    %c0 = arith.constant 0 : index
    %c0_0 = arith.constant 0 : index
    %0 = vector.load %arg3[%c0, %c0_0] : memref<8x8xf32, #tpu.memory_space<vmem>>, vector<8x8xf32>
    %c0_1 = arith.constant 0 : index
    %c0_2 = arith.constant 0 : index
    %c0_3 = arith.constant 0 : index
    %1 = vector.load %arg2[%c0_1, %c0_2, %c0_3] : memref<1x8x16xf32, #tpu.memory_space<vmem>>, vector<1x8x16xf32>
    %2 = vector.shape_cast %1 : vector<1x8x16xf32> to vector<8x16xf32>
    %cst = arith.constant dense<0.000000e+00> : vector<8x16xf32>
    %3 = tpu.matmul %0, %2, %cst {dimension_numbers = #tpu.dot_dimension_numbers<[1], [0], [0], [1], [0, 0, 1, 1], [], []>} : vector<8x8xf32>, vector<8x16xf32>, vector<8x16xf32> -> vector<8x16xf32>
    %c0_4 = arith.constant 0 : index
    %c0_5 = arith.constant 0 : index
    %4 = vector.load %arg4[%c0_4, %c0_5] : memref<16x64xf32, #tpu.memory_space<vmem>>, vector<16x64xf32>
    %cst_6 = arith.constant dense<0.000000e+00> : vector<8x64xf32>
    %5 = tpu.matmul %3, %4, %cst_6 {dimension_numbers = #tpu.dot_dimension_numbers<[1], [0], [0], [1], [0, 0, 1, 1], [], []>} : vector<8x16xf32>, vector<16x64xf32>, vector<8x64xf32> -> vector<8x64xf32>
    %c0_7 = arith.constant 0 : index
    %c0_8 = arith.constant 0 : index
    %c0_9 = arith.constant 0 : index
    %c0_10 = arith.constant 0 : index
    %6 = vector.load %arg5[%c0_7, %c0_8, %c0_9, %c0_10] : memref<1x8x8x64xf32, #tpu.memory_space<vmem>>, vector<1x8x8x64xf32>
    %7 = vector.shape_cast %6 : vector<1x8x8x64xf32> to vector<8x8x64xf32>
    %8 = vector.shape_cast %5 : vector<8x64xf32> to vector<1x8x64xf32>
    %9 = vector.broadcast %8 : vector<1x8x64xf32> to vector<8x8x64xf32>
    %10 = arith.mulf %7, %9 : vector<8x8x64xf32>
    %c0_11 = arith.constant 0 : index
    %c0_12 = arith.constant 0 : index
    %c0_13 = arith.constant 0 : index
    %c0_14 = arith.constant 0 : index
    %11 = vector.load %arg6[%c0_11, %c0_12, %c0_13, %c0_14] : memref<1x8x8x64xf32, #tpu.memory_space<vmem>>, vector<1x8x8x64xf32>
    %12 = vector.shape_cast %11 : vector<1x8x8x64xf32> to vector<8x8x64xf32>
    %13 = vector.shape_cast %10 : vector<8x8x64xf32> to vector<1x8x8x64xf32>
    tpu.vector_store %arg6[%c0_11, %c0_12, %c0_13, %c0_14], %13 {strides = array<i32>} : memref<1x8x8x64xf32, #tpu.memory_space<vmem>>, vector<1x8x8x64xf32>,
    return
  }
  func.func @transform_0(%arg0: i32, %arg1: i32) -> (i32, i32, i32) {
    %c0_i32 = arith.constant 0 : i32
    %c0_i32_0 = arith.constant 0 : i32
    %c0_i32_1 = arith.constant 0 : i32
    return %arg0, %c0_i32, %c0_i32_0 : i32, i32, i32
  }
  func.func @transform_1(%arg0: i32, %arg1: i32) -> (i32, i32) {
    %c0_i32 = arith.constant 0 : i32
    %c0_i32_0 = arith.constant 0 : i32
    return %arg1, %c0_i32 : i32, i32
  }
  func.func @transform_2(%arg0: i32, %arg1: i32) -> (i32, i32) {
    %c0_i32 = arith.constant 0 : i32
    %c0_i32_0 = arith.constant 0 : i32
    %c0_i32_1 = arith.constant 0 : i32
    return %c0_i32, %c0_i32_0 : i32, i32
  }
  func.func @transform_3(%arg0: i32, %arg1: i32) -> (i32, i32, i32, i32) {
    %c0_i32 = arith.constant 0 : i32
    %c0_i32_0 = arith.constant 0 : i32
    %c0_i32_1 = arith.constant 0 : i32
    return %arg0, %c0_i32, %arg1, %c0_i32_0 : i32, i32, i32, i32
  }
  func.func @transform_4(%arg0: i32, %arg1: i32) -> (i32, i32, i32, i32) {
    %c0_i32 = arith.constant 0 : i32
    %c0_i32_0 = arith.constant 0 : i32
    %c0_i32_1 = arith.constant 0 : i32
    return %arg0, %c0_i32, %arg1, %c0_i32_0 : i32, i32, i32, i32
  }
}

</mosaic_0001>

<bundles_post_ra>
// kernel: attention_block_pallas.3
= control target key start
LH: loop header
LB: loop body
LE: loop exit
PB: predicated region body
PF: predicated region fallthrough
CT: control target
= control target key end

     0   :  { %s1026_s26 = smov 0   ;;  %s1028_s27 = smov 0   ;;  %s1116_s0 = inlined_call_operand.vmem [shape: f32[2,8,512], index: 0, kind: input, shape index: {}]   ;;  %s1117_s1 = inlined_call_operand.vmem [shape: f32[2,32,512], index: 1, kind: input, shape index: {}]   ;;  %s1118_s2 = inlined_call_operand.vmem [shape: f32[8,32], index: 2, kind: input, shape index: {}]   ;;  %s1119_s3 = inlined_call_operand.vmem [shape: f32[8,8], index: 3, kind: input, shape index: {}]   ;;  %s1120_s4 = inlined_call_operand.vmem [shape: f32[8,1], index: 4, kind: input, shape index: {}]   ;;  %s1121_s5 = inlined_call_operand.vmem [shape: f32[8,1], index: 5, kind: input, shape index: {}]   ;;  %s1122_s6 = inlined_call_operand.<no memory space> [shape: f32[1,1], index: 6, kind: input, shape index: {}]   ;;  %s1123_s7 = inlined_call_operand.vmem [shape: f32[2,8,512], index: 7, kind: output, shape index: {}]  }
   0x1   :  { %v12_v0 = vstv %s1122_s6  ;;  %s1030_s28 = smov 0  }
   0x2   :  { %13 = vst [vmem:[#allocation2] sm:$0x1] %v12_v0 }
   0x3 LB: > { %s31_s6 = sadd.s32 1, %s975_s27  ;;  %p873_p0 = scmp.ge.s32.totalorder %s979_s28, 1  ;;  %s979_s28 = sphi %s1030_s28, %s19_s28   ;;  %s975_s27 = sphi %s1028_s27, %s1125_s27   ;;  %s971_s26 = sphi %s1026_s26, %s1124_s26  }
   0x4   : > { %p33_p1 = scmp.ge.s32.totalorder %s31_s6, 2  ;;  %p277_p2 = scmp.lt.s32.totalorder %s979_s28, 3 }
   0x6   : > { %s1127_s6 = smov (%p33_p1, %s31_s6), 0  ;;  %p278_p3 = pnand %p873_p0, %p277_p2 }
   0x7   : > { %p327_p4 = scmp.lt.s32.totalorder (!%p278_p3), %s971_s26, 1  ;;  %v981_v1 = vmov (!%p278_p3), 0.0   ;;  %v670_v2 = vld [vmem:[%s1120_s4] sm:$0xff] (!%p278_p3)  ;;  %v982_v4 = vmov (!%p278_p3), 0   ;;  %vm378_vm0 = vcmask (!%p278_p3), 64512   ;;  %vm524_vm1 = vcmask (!%p278_p3), 261120  }
   0x8   : > { %281 = sbr.rel (%p278_p3) target bundleno = 295 (0x127), region = 48  ;;  %446 = vmatprep.mubr.f32.mxu0 (!%p278_p3), %v981_v1  ;;  %517 = vmatprep.mubr.f32.mxu1 (!%p278_p3), %v981_v1  ;;  %v377_v5 = vld [vmem:[%s1119_s3] sm:$0xff] (!%p278_p3)  ;;  %v724_v47 = vlaneseq (!%p278_p3) }
   0x9   : > { %v718_v3 = vld [vmem:[#allocation2] sm:$0x1] (!%p278_p3)  ;;  %939 = vset.pattern.permute.xlu0 (!%p278_p3), %v982_v4  ;;  %940 = vset.pattern.permute.xlu1 (!%p278_p3), %v982_v4 }
   0xa   : > { %673 = vperm.xlu0 (!%p278_p3), %939, %v670_v2   ;;  %721 = vperm.xlu1 (!%p278_p3), %940, %v718_v3   ;;  %v684_v16 = vld [vmem:[%s1121_s5] sm:$0xff] (!%p278_p3)  ;;  %v725_v57 = vshrl.u32 (!%p278_p3), %v724_v47, 7 }
   0xb   : > { %v360_v35 = vld [vmem:[%s1118_s2] sm:$0xff] (!%p278_p3) }
   0xc   : > { %v726_v2 = vsub.s32 (!%p278_p3), 0, %v725_v57 }
   0xe   : > { %687 = vperm.xlu0 (!%p278_p3), %939, %v684_v16  }
   0xf   : > { %s1129_s26 = smov (!%p327_p4, %s971_s26), 1 }
  0x10   : > { %s890_s8 = sshll.u32 %s1129_s26, 5  ;;  %s891_s9 = sshll.u32 %s1129_s26, 7 }
  0x11   : > { %s334_s12 = scalar_lea.vmem %s1116_s0, %s890_s8  ;;  %s1059_s15 = scalar_lea.vmem %s1117_s1, %s891_s9 }
  0x12   : > { %v1064_v6 = vld [vmem:[%s334_s12 + $0x8] sm:$0xff]  ;;  %v1066_v7 = vld [vmem:[%s334_s12 + $0x18] sm:$0xff]  ;;  %v1068_v8 = vld [vmem:[%s334_s12] sm:$0xff]  ;;  %s354_s24 = scalar_lea.vmem %s1123_s7, %s890_s8 }
  0x13   : > { %382 = vmatprep.subr.mxu0 %v1064_v6  ;;  %453 = vmatprep.subr.mxu1 %v1066_v7  ;;  %v1072_v9 = vld [vmem:[%s334_s12 + $0x10] sm:$0xff]  ;;  %v362_v10 = vld [vmem:[%s1059_s15 + $0x8] sm:$0xff]  ;;  %v364_v13 = vld [vmem:[%s1059_s15 + $0x18] sm:$0xff] }
  0x14   : > { %v366_v11 = vld [vmem:[%s1059_s15 + $0x28] sm:$0xff]  ;;  %383 = vmatpush1.msra.mxu0 %v1068_v8  ;;  %454 = vmatpush1.msra.mxu1 %v1072_v9  ;;  %v368_v14 = vld [vmem:[%s1059_s15 + $0x38] sm:$0xff]  ;;  %v361_v15 = vld [vmem:[%s1059_s15] sm:$0xff] }
  0x15   : > { %v893_v12 = vpack.c.bf16 %v366_v11, %v362_v10  ;;  %880 = vmatmul.mubr.msk.f32.vlgmr.msra.gmra.mrb[0].mxu0 %vm378_vm0, %v377_v5  ;;  %881 = vmatmul.mubr.msk.f32.vlgmr.msra.gmra.mrb[0].mxu1 %vm378_vm0, %v377_v5  ;;  %v901_v17 = vpack.c.bf16 %v368_v14, %v364_v13  ;;  %v365_v18 = vld [vmem:[%s1059_s15 + $0x20] sm:$0xff]  ;;  %v363_v19 = vld [vmem:[%s1059_s15 + $0x10] sm:$0xff]  ;;  %v370_v23 = vld [vmem:[%s1059_s15 + $0x48] sm:$0xff] }
  0x16   : > { %v367_v20 = vld [vmem:[%s1059_s15 + $0x30] sm:$0xff]  ;;  %v895_v21 = vpack.c.bf16 %v365_v18, %v361_v15  ;;  %v374_v24 = vld [vmem:[%s1059_s15 + $0x68] sm:$0xff]  ;;  %v372_v25 = vld [vmem:[%s1059_s15 + $0x58] sm:$0xff]  ;;  %592 = vmatprep.mubr.f32.mxu0 %v981_v1  ;;  %663 = vmatprep.mubr.f32.mxu1 %v981_v1 }
  0x17   : > { %894 = vmatprep.subr.bf16.mxu0 %v893_v12  ;;  %v903_v22 = vpack.c.bf16 %v367_v20, %v363_v19  ;;  %902 = vmatprep.subr.bf16.mxu1 %v901_v17  ;;  %v897_v26 = vpack.c.bf16 %v374_v24, %v370_v23  ;;  %v376_v27 = vld [vmem:[%s1059_s15 + $0x78] sm:$0xff]  ;;  %v369_v28 = vld [vmem:[%s1059_s15 + $0x40] sm:$0xff]  ;;  %v371_v32 = vld [vmem:[%s1059_s15 + $0x50] sm:$0xff] }
  0x18   : > { %v373_v29 = vld [vmem:[%s1059_s15 + $0x60] sm:$0xff]  ;;  %896 = vmatpush1.bf16.msra.mxu0 %v895_v21  ;;  %v905_v30 = vpack.c.bf16 %v376_v27, %v372_v25  ;;  %v375_v33 = vld [vmem:[%s1059_s15 + $0x70] sm:$0xff] }
  0x19   : > { %904 = vmatpush1.bf16.msra.mxu1 %v903_v22  ;;  %v899_v31 = vpack.c.bf16 %v373_v29, %v369_v28  ;;  %898 = vmatprep.subr.bf16.mxu0 %v897_v26  ;;  %v907_v34 = vpack.c.bf16 %v375_v33, %v371_v32 }
  0x1a   : > { %906 = vmatprep.subr.bf16.mxu1 %v905_v30 }
  0x1c   : > { %900 = vmatpush1.bf16.msra.mxu0 %v899_v31 }
  0x1d   : > { %908 = vmatpush1.bf16.msra.mxu1 %v907_v34 }
  0x1f   : > { %882 = vmatmul.mubr.msk.f32.vlgmr.msra.gmra.mrb[0].mxu0 %vm524_vm1, %v360_v35 }
  0x20   : > { %883 = vmatmul.mubr.msk.f32.vlgmr.msra.gmra.mrb[0].mxu1 %vm524_vm1, %v360_v35 }
  0x89   : > { %v674_v36 = vpop.permute.xlu0 %673  ;;  %v722_v5 = vpop.permute.xlu1 %721 }
  0x8a   : > { %v727_v16 = vrot.slane %v722_v5, %v726_v2 }
  0x8d   : > { %v688_v50 = vpop.permute.xlu0 %687 }
  0xf2   : > { %v594_v37 = vpop.f32.mrb[0].mxu0 }
  0xf3   : > { %v665_v38 = vpop.f32.mrb[0].mxu1  ;;  %v676_v39 = vadd.f32 %v674_v36, %v594_v37  ;;  %v596_v41 = vpop.f32.mrb[1].mxu0 }
  0xf4   : > { %v678_v40 = vadd.f32 %v674_v36, %v665_v38  ;;  %v667_v42 = vpop.f32.mrb[1].mxu1  ;;  %v677_v43 = vadd.f32 %v674_v36, %v596_v41 }
  0xf5   : > { %v679_v44 = vadd.f32 %v674_v36, %v667_v42  ;;  %v680_v45 = vmax.f32 %v676_v39, 0.0 }
  0xf6   : > { %v682_v46 = vmax.f32 %v678_v40, 0.0  ;;  %v681_v48 = vmax.f32 %v677_v43, 0.0 }
  0xf7   : > { %v683_v49 = vmax.f32 %v679_v44, 0.0  ;;  %v690_v51 = vmul.f32 %v688_v50, %v680_v45 }
  0xf8   : > { %v692_v52 = vmul.f32 %v688_v50, %v682_v46  ;;  %v691_v53 = vmul.f32 %v688_v50, %v681_v48 }
  0xf9   : > { %v693_v54 = vmul.f32 %v688_v50, %v683_v49  ;;  %v694_v55 = vrot.slane %v690_v51, 4 }
  0xfa   : > { %v706_v56 = vrot.slane %v692_v52, 4  ;;  %v700_v58 = vrot.slane %v691_v53, 4 }
  0xfb   : > { %v712_v59 = vrot.slane %v693_v54, 4  ;;  %v695_v60 = vadd.f32 %v694_v55, %v690_v51 }
  0xfc   : > { %v707_v61 = vadd.f32 %v706_v56, %v692_v52  ;;  %v701_v62 = vadd.f32 %v700_v58, %v691_v53 }
  0xfd   : > { %v713_v63 = vadd.f32 %v712_v59, %v693_v54  ;;  %v696_v0 = vrot.slane %v695_v60, 2 }
  0xfe   : > { %v708_v1 = vrot.slane %v707_v61, 2  ;;  %v702_v3 = vrot.slane %v701_v62, 2 }
  0xff   : > { %v714_v4 = vrot.slane %v713_v63, 2  ;;  %v697_v10 = vadd.f32 %v696_v0, %v695_v60 }
 0x100   : > { %v709_v11 = vadd.f32 %v708_v1, %v707_v61  ;;  %v703_v12 = vadd.f32 %v702_v3, %v701_v62 }
 0x101   : > { %v715_v13 = vadd.f32 %v714_v4, %v713_v63  ;;  %v698_v14 = vrot.slane %v697_v10, 1 }
 0x102   : > { %v710_v15 = vrot.slane %v709_v11, 1  ;;  %v704_v17 = vrot.slane %v703_v12, 1 }
 0x103   : > { %v716_v18 = vrot.slane %v715_v13, 1  ;;  %v699_v19 = vadd.f32 %v698_v14, %v697_v10 }
 0x104   : > { %v711_v20 = vadd.f32 %v710_v15, %v709_v11  ;;  %v705_v21 = vadd.f32 %v704_v17, %v703_v12 }
 0x105   : > { %v717_v22 = vadd.f32 %v716_v18, %v715_v13  ;;  %v728_v23 = vadd.f32 %v727_v16, %v699_v19 }
 0x106   : > { %v730_v24 = vadd.f32 %v727_v16, %v711_v20  ;;  %v729_v25 = vadd.f32 %v727_v16, %v705_v21 }
 0x107   : > { %v731_v26 = vadd.f32 %v727_v16, %v717_v22  ;;  %v884_v27 = vmul.f32 -1.442695, %v728_v23 }
 0x108   : > { %v886_v28 = vmul.f32 -1.442695, %v730_v24  ;;  %v885_v29 = vmul.f32 -1.442695, %v729_v25 }
 0x109   : > { %v887_v30 = vmul.f32 -1.442695, %v731_v26  ;;  %941 = vpow2.f32 %v884_v27 }
 0x10a   : > { %943 = vpow2.f32 %v885_v29 }
 0x10b   : > { %945 = vpow2.f32 %v886_v28 }
 0x10c   : > { %947 = vpow2.f32 %v887_v30 }
 0x113   : > { %v942_v31 = vpop.eup %941 }
 0x114   : > { %v944_v32 = vpop.eup %943  ;;  %v744_v33 = vadd.f32 1.0, %v942_v31 }
 0x115   : > { %v946_v34 = vpop.eup %945  ;;  %v745_v35 = vadd.f32 1.0, %v944_v32 }
 0x116   : > { %v948_v36 = vpop.eup %947  ;;  %v746_v37 = vadd.f32 1.0, %v946_v34  ;;  %949 = vrcp.f32 %v744_v33 }
 0x117   : > { %v747_v38 = vadd.f32 1.0, %v948_v36  ;;  %951 = vrcp.f32 %v745_v35 }
 0x118   : > { %953 = vrcp.f32 %v746_v37 }
 0x119   : > { %955 = vrcp.f32 %v747_v38 }
 0x120   : > { %v950_v39 = vpop.eup %949 }
 0x121   : > { %v952_v40 = vpop.eup %951  ;;  %v756_v41 = vmul.f32 %v950_v39, %v1068_v8 }
 0x122   : > { %v954_v42 = vpop.eup %953  ;;  %v757_v43 = vmul.f32 %v952_v40, %v1064_v6 }
 0x123   : > { %v956_v44 = vpop.eup %955  ;;  %v758_v45 = vmul.f32 %v954_v42, %v1072_v9  ;;  %760 = vst [vmem:[%s354_s24] sm:$0xff] %v756_v41 }
 0x124   : > { %v759_v46 = vmul.f32 %v956_v44, %v1066_v7  ;;  %761 = vst [vmem:[%s354_s24 + $0x8] sm:$0xff] %v757_v43 }
 0x125   : > { %762 = vst [vmem:[%s354_s24 + $0x10] sm:$0xff] %v758_v45 }
 0x126   : > { %763 = vst [vmem:[%s354_s24 + $0x18] sm:$0xff] %v759_v46 }
 0x127 PF: > { %s19_s28 = sadd.s32 1, %s979_s28   ;;  %s1124_s26 = smov %s975_s27 }
 0x128   : > { %p16_p5 = scmp.ge.s32.totalorder %s19_s28, 4   ;;  %s1125_s27 = smov %s1127_s6 }
 0x12a   :  { %18 = sbr.rel (!%p16_p5) target bundleno = 3 (0x3), region = 81 }

// kernel: attention_block_pallas.4
= control target key start
LH: loop header
LB: loop body
LE: loop exit
PB: predicated region body
PF: predicated region fallthrough
CT: control target
= control target key end

     0   :  { %s843_s26 = smov 0   ;;  %s845_s27 = smov 0   ;;  %s914_s0 = inlined_call_operand.vmem [shape: f32[2,16,64], index: 0, kind: input, shape index: {}]   ;;  %s915_s1 = inlined_call_operand.vmem [shape: f32[2,64,64], index: 1, kind: input, shape index: {}]   ;;  %s916_s2 = inlined_call_operand.vmem [shape: f32[16,16], index: 2, kind: input, shape index: {}]   ;;  %s917_s3 = inlined_call_operand.vmem [shape: f32[16,64], index: 3, kind: input, shape index: {}]   ;;  %s918_s4 = inlined_call_operand.vmem [shape: f32[16,1], index: 4, kind: input, shape index: {}]   ;;  %s919_s5 = inlined_call_operand.vmem [shape: f32[16,1], index: 5, kind: input, shape index: {}]   ;;  %s920_s6 = inlined_call_operand.<no memory space> [shape: f32[1,1], index: 6, kind: input, shape index: {}]   ;;  %s921_s7 = inlined_call_operand.vmem [shape: f32[2,1,64], index: 7, kind: output, shape index: {}]  }
   0x1   :  { %v12_v0 = vstv %s920_s6  ;;  %s847_s28 = smov 0  }
   0x2   :  { %13 = vst [vmem:[#allocation2] sm:$0x1] %v12_v0 }
   0x3 LB: > { %s31_s6 = sadd.s32 1, %s793_s27  ;;  %p668_p0 = scmp.ge.s32.totalorder %s797_s28, 1  ;;  %s797_s28 = sphi %s847_s28, %s19_s28   ;;  %s793_s27 = sphi %s845_s27, %s923_s27   ;;  %s789_s26 = sphi %s843_s26, %s922_s26  }
   0x4   : > { %p33_p1 = scmp.ge.s32.totalorder %s31_s6, 2  ;;  %p273_p2 = scmp.lt.s32.totalorder %s797_s28, 3 }
   0x6   : > { %s925_s6 = smov (%p33_p1, %s31_s6), 0  ;;  %p274_p3 = pnand %p668_p0, %p273_p2 }
   0x7   : > { %p317_p4 = scmp.lt.s32.totalorder (!%p274_p3), %s789_s26, 1  ;;  %v339_v1 = vld [vmem:[%s916_s2] sm:$0xff] (!%p274_p3)  ;;  %vm435_vm0 = vcmask (!%p274_p3), 130048   ;;  %vm353_vm1 = vcmask (!%p274_p3), 523264   ;;  %v799_v4 = vmov (!%p274_p3), 0   ;;  %v518_v6 = vld [vmem:[%s918_s4 + $0x8] sm:$0xff] (!%p274_p3)  ;;  %v562_v44 = vlaneseq (!%p274_p3) }
   0x8   : > { %277 = sbr.rel (%p274_p3) target bundleno = 302 (0x12e), region = 48  ;;  %v343_v2 = vld [vmem:[%s917_s3] sm:$0xff] (!%p274_p3)  ;;  %719 = vmatprep.mubr.msk.f32.mxu0 (!%p274_p3), %vm435_vm0, %v339_v1  ;;  %769 = vset.pattern.permute.xlu0 (!%p274_p3), %v799_v4  ;;  %v534_v7 = vld [vmem:[%s919_s5 + $0x8] sm:$0xff] (!%p274_p3)  ;;  %vm573_vm2 = vcmask (!%p274_p3), 516096  }
   0x9   : > { %712 = vmatprep.mubr.msk.f32.mxu1 (!%p274_p3), %vm353_vm1, %v343_v2  ;;  %v517_v3 = vld [vmem:[%s918_s4] sm:$0xff] (!%p274_p3)  ;;  %770 = vset.pattern.permute.xlu1 (!%p274_p3), %v799_v4  ;;  %v340_v23 = vld [vmem:[%s916_s2 + $0x8] sm:$0xff] (!%p274_p3)  ;;  %v563_v47 = vshrl.u32 (!%p274_p3), %v562_v44, 7 }
   0xa   : > { %v533_v5 = vld [vmem:[%s919_s5] sm:$0xff] (!%p274_p3)  ;;  %521 = vperm.xlu0 (!%p274_p3), %769, %v517_v3   ;;  %v344_v25 = vld [vmem:[%s917_s3 + $0x8] sm:$0xff] (!%p274_p3) }
   0xb   : > { %537 = vperm.xlu1 (!%p274_p3), %770, %v533_v5   ;;  %v556_v19 = vld [vmem:[#allocation2] sm:$0x1] (!%p274_p3)  ;;  %v564_v50 = vsub.s32 (!%p274_p3), 0, %v563_v47 }
   0xe   : > { %526 = vperm.xlu0 (!%p274_p3), %769, %v518_v6  }
   0xf   : > { %s927_s26 = smov (!%p317_p4, %s789_s26), 1  ;;  %542 = vperm.xlu1 %770, %v534_v7  }
  0x10   : > { %s681_s14 = sshll.u32 %s927_s26, 6  ;;  %s680_s22 = sshll.u32 %s927_s26, 4 }
  0x11   : > { %s332_s21 = scalar_lea.vmem %s915_s1, %s681_s14  ;;  %s324_s25 = scalar_lea.vmem %s914_s0, %s680_s22 }
  0x12   : > { %v345_v8 = vld [vmem:[%s332_s21] sm:$0xff]  ;;  %v346_v9 = vld [vmem:[%s332_s21 + $0x8] sm:$0xff]  ;;  %v347_v10 = vld [vmem:[%s332_s21 + $0x10] sm:$0xff]  ;;  %559 = vperm.xlu0 %769, %v556_v19   ;;  %s338_s12 = scalar_lea.vmem %s921_s7, %s927_s26 }
  0x13   : > { %v722_v11 = vpack.c.bf16 %v346_v9, %v345_v8  ;;  %v348_v12 = vld [vmem:[%s332_s21 + $0x18] sm:$0xff]  ;;  %v349_v13 = vld [vmem:[%s332_s21 + $0x20] sm:$0xff]  ;;  %v350_v15 = vld [vmem:[%s332_s21 + $0x28] sm:$0xff] }
  0x14   : > { %v726_v14 = vpack.c.bf16 %v348_v12, %v347_v10  ;;  %v341_v16 = vld [vmem:[%s324_s25] sm:$0xff]  ;;  %v342_v17 = vld [vmem:[%s324_s25 + $0x8] sm:$0xff]  ;;  %v730_v20 = vpack.c.bf16 %v350_v15, %v349_v13  ;;  %v351_v21 = vld [vmem:[%s332_s21 + $0x30] sm:$0xff] }
  0x15   : > { %723 = vmatprep.subr.bf16.mxu1 %v722_v11  ;;  %v738_v18 = vpack.c.bf16 %v342_v17, %v341_v16  ;;  %v352_v22 = vld [vmem:[%s332_s21 + $0x38] sm:$0xff] }
  0x16   : > { %725 = vmatpush3.bf16.msra.mxu1 %v722_v11  ;;  %v734_v24 = vpack.c.bf16 %v352_v22, %v351_v21 }
  0x17   : > { %727 = vmatprep.subr.bf16.mxu1 %v726_v14  ;;  %739 = vmatprep.subr.bf16.mxu0 %v738_v18 }
  0x18   : > { %741 = vmatpush3.bf16.msra.mxu0 %v738_v18 }
  0x1a   : > { %729 = vmatpush3.bf16.msra.mxu1 %v726_v14 }
  0x1b   : > { %731 = vmatprep.subr.bf16.mxu1 %v730_v20  ;;  %720 = vmatmul.mubr.msk.f32.vlgmr.msra.gmra.mrb[0].mxu0 %vm435_vm0, %v340_v23 }
  0x1e   : > { %733 = vmatpush3.bf16.msra.mxu1 %v730_v20 }
  0x1f   : > { %735 = vmatprep.subr.bf16.mxu1 %v734_v24 }
  0x22   : > { %737 = vmatpush3.bf16.msra.mxu1 %v734_v24 }
  0x25   : > { %713 = vmatmul.mubr.msk.f32.vlgmr.msra.gmra.mrb[0].mxu1 %vm353_vm1, %v344_v25 }
  0x89   : > { %v522_v28 = vpop.permute.xlu0 %521 }
  0x8a   : > { %v538_v29 = vpop.permute.xlu1 %537 }
  0x8d   : > { %v527_v33 = vpop.permute.xlu0 %526 }
  0x8e   : > { %v543_v39 = vpop.permute.xlu1 %542 }
  0x91   : > { %v560_v52 = vpop.permute.xlu0 %559 }
  0x92   : > { %v565_v54 = vrot.slane %v560_v52, %v564_v50 }
  0xee   : > { %v721_v26 = vpop.f32.mrb[0].mxu0 }
  0xef   : > { %v508_v27 = vpop.f32.mrb[1].mxu0 }
  0xf8   : > { %v714_v30 = vpop.f32.mrb[0].mxu1 }
  0xf9   : > { %v514_v31 = vadd.f32 %v721_v26, %v714_v30  ;;  %v426_v32 = vpop.f32.mrb[1].mxu1 }
  0xfa   : > { %v509_v34 = vadd.f32 %v508_v27, %v426_v32 }
  0xfb   : > { %v530_v35 = vadd.f32 %v527_v33, %v514_v31 }
  0xfc   : > { %v529_v36 = vadd.f32 %v522_v28, %v509_v34 }
  0xfd   : > { %v532_v37 = vmax.f32 %v530_v35, 0.0 }
  0xfe   : > { %v531_v38 = vmax.f32 %v529_v36, 0.0 }
  0xff   : > { %v546_v40 = vmul.f32 %v543_v39, %v532_v37 }
 0x100   : > { %v545_v41 = vmul.f32 %v538_v29, %v531_v38 }
 0x101   : > { %v548_v42 = vsel %vm353_vm1, %v546_v40, 0.0 }
 0x102   : > { %v547_v43 = vsel %vm353_vm1, %v545_v41, 0.0 }
 0x103   : > { %v549_v45 = vadd.f32 %v548_v42, %v547_v43 }
 0x105   : > { %v550_v46 = vrot.slane %v549_v45, 4 }
 0x107   : > { %v551_v48 = vadd.f32 %v550_v46, %v549_v45 }
 0x109   : > { %v552_v49 = vrot.slane %v551_v48, 2 }
 0x10b   : > { %v553_v51 = vadd.f32 %v552_v49, %v551_v48 }
 0x10d   : > { %v554_v53 = vrot.slane %v553_v51, 1 }
 0x10f   : > { %v555_v55 = vadd.f32 %v554_v53, %v553_v51 }
 0x111   : > { %v566_v56 = vadd.f32 %v565_v54, %v555_v55 }
 0x113   : > { %v677_v57 = vmul.f32 -1.442695, %v566_v56 }
 0x115   : > { %771 = vpow2.f32 %v677_v57 }
 0x11f   : > { %v772_v58 = vpop.eup %771 }
 0x120   : > { %v570_v59 = vadd.f32 1.0, %v772_v58 }
 0x122   : > { %773 = vrcp.f32 %v570_v59 }
 0x12c   : > { %v774_v60 = vpop.eup %773 }
 0x12d   : > { %574 = vst.msk [vmem:[%s338_s12] sm:$0x1] %vm573_vm2, %v774_v60 }
 0x12e PF: > { %s19_s28 = sadd.s32 1, %s797_s28   ;;  %s922_s26 = smov %s793_s27 }
 0x12f   : > { %p16_p5 = scmp.ge.s32.totalorder %s19_s28, 4   ;;  %s923_s27 = smov %s925_s6 }
 0x131   :  { %18 = sbr.rel (!%p16_p5) target bundleno = 3 (0x3), region = 81 }

// kernel: attention_block_pallas.5
= control target key start
LH: loop header
LB: loop body
LE: loop exit
PB: predicated region body
PF: predicated region fallthrough
CT: control target
= control target key end

     0   :  { %s667_s15 = smov 0   ;;  %s669_s16 = smov 0   ;;  %s720_s0 = inlined_call_operand.vmem [shape: f32[2,8,16], index: 0, kind: input, shape index: {}]   ;;  %s721_s1 = inlined_call_operand.vmem [shape: f32[8,8], index: 1, kind: input, shape index: {}]   ;;  %s722_s2 = inlined_call_operand.vmem [shape: f32[16,64], index: 2, kind: input, shape index: {}]   ;;  %s723_s3 = inlined_call_operand.vmem [shape: f32[2,8,8,64], index: 3, kind: input, shape index: {}]   ;;  %s724_s4 = inlined_call_operand.vmem [shape: f32[2,8,8,64], index: 4, kind: output, shape index: {}]  }
   0x1   :  { %s671_s17 = smov 0  }
   0x2 LB: > { %s26_s18 = sadd.s32 1, %s633_s16  ;;  %p556_p0 = scmp.ge.s32.totalorder %s637_s17, 1  ;;  %s637_s17 = sphi %s671_s17, %s14_s17   ;;  %s633_s16 = sphi %s669_s16, %s726_s16   ;;  %s629_s15 = sphi %s667_s15, %s725_s15  }
   0x3   : > { %p28_p1 = scmp.ge.s32.totalorder %s26_s18, 2  ;;  %p199_p2 = scmp.lt.s32.totalorder %s637_s17, 3 }
   0x5   : > { %s728_s18 = smov (%p28_p1, %s26_s18), 0  ;;  %p200_p3 = pnand %p556_p0, %p199_p2 }
   0x6   : > { %p239_p4 = scmp.lt.s32.totalorder (!%p200_p3), %s629_s15, 1  ;;  %v639_v0 = vmov (!%p200_p3), 0.0   ;;  %vm640_vm0 = vmmov (!%p200_p3), 0   ;;  %v339_v1 = vld [vmem:[%s722_s2] sm:$0xff] (!%p200_p3)  ;;  %v340_v2 = vld [vmem:[%s722_s2 + $0x8] sm:$0xff] (!%p200_p3)  ;;  %v641_v3 = vmov (!%p200_p3), 0.0|0.0  }
   0x7   : > { %203 = sbr.rel (%p200_p3) target bundleno = 449 (0x1c1), region = 36  ;;  %573 = vmatprep.subr.mxu0 (!%p200_p3), %v639_v0  ;;  %575 = vmatprep.mubr.msk.f32.mxu0 (!%p200_p3), %vm640_vm0, %v639_v0  ;;  %v586_v4 = vpack.c.bf16 (!%p200_p3), %v340_v2, %v339_v1  ;;  %v263_v5 = vld [vmem:[%s721_s1] sm:$0xff] (!%p200_p3)  ;;  %vm265_vm1 = vcmask (!%p200_p3), 64512   ;;  %vm341_vm2 = vcmask (!%p200_p3), 130048   ;;  %vm431_vm3 = vcmask (!%p200_p3), 523264  }
   0x8   : > { %585 = vmatprep.subr.bf16.mxu1 (!%p200_p3), %v641_v3  ;;  %582 = vmatprep.mubr.msk.f32.mxu1 (!%p200_p3), %vm640_vm0, %v639_v0 }
   0x9   : > { %587 = vmatpush3.bf16.msra.mxu1 (!%p200_p3), %v586_v4 }
   0xe   : > { %s730_s15 = smov (!%p239_p4, %s629_s15), 1 }
   0xf   : > { %s557_s23 = sshll.u32 %s730_s15, 3  ;;  %s566_s29 = sshll.u32 %s730_s15, 6 }
  0x10   : > { %s242_s26 = scalar_lea.vmem %s720_s0, %s557_s23  ;;  %s254_s6 = scalar_lea.vmem %s723_s3, %s566_s29 }
  0x11   : > { %v264_v6 = vld [vmem:[%s242_s26] sm:$0xff]  ;;  %v416_v10 = vld [vmem:[%s254_s6 + $0x8] sm:$0xff]  ;;  %v417_v11 = vld [vmem:[%s254_s6 + $0x10] sm:$0xff]  ;;  %s262_s9 = scalar_lea.vmem %s724_s4, %s566_s29 }
  0x12   : > { %574 = vmatpush3.msra.mxu0 %v264_v6  ;;  %v415_v9 = vld [vmem:[%s254_s6] sm:$0xff]  ;;  %v418_v12 = vld [vmem:[%s254_s6 + $0x18] sm:$0xff]  ;;  %v420_v14 = vld [vmem:[%s254_s6 + $0x28] sm:$0xff] }
  0x13   : > { %576 = vmatmul.mubr.msk.f32.vlgmr.msra.gmra.mrb[0].mxu0 %vm265_vm1, %v263_v5  ;;  %v419_v13 = vld [vmem:[%s254_s6 + $0x20] sm:$0xff]  ;;  %v421_v15 = vld [vmem:[%s254_s6 + $0x30] sm:$0xff]  ;;  %v422_v16 = vld [vmem:[%s254_s6 + $0x38] sm:$0xff] }
  0xe6   : > { %v335_v7 = vpop.f32.mrb[0].mxu0 }
  0xe7   : > { %v577_v8 = vpop.f32.mrb[1].mxu0  ;;  %583 = vmatmul.mubr.msk.f32.vlgmr.msra.gmra.mrb[0].mxu1 %vm341_vm2, %v335_v7 }
 0x1ba   : > { %v411_v17 = vpop.f32.mrb[0].mxu1 }
 0x1bb   : > { %v423_v18 = vmul.f32 %v415_v9, %v411_v17  ;;  %v424_v19 = vmul.f32 %v416_v10, %v411_v17  ;;  %v425_v20 = vmul.f32 %v417_v11, %v411_v17  ;;  %v426_v21 = vmul.f32 %v418_v12, %v411_v17  ;;  %v584_v22 = vpop.f32.mrb[1].mxu1 }
 0x1bc   : > { %v427_v23 = vmul.f32 %v419_v13, %v411_v17  ;;  %v428_v24 = vmul.f32 %v420_v14, %v411_v17  ;;  %v429_v25 = vmul.f32 %v421_v15, %v411_v17  ;;  %v430_v26 = vmul.f32 %v422_v16, %v411_v17 }
 0x1bd   : > { %432 = vst.msk [vmem:[%s262_s9] sm:$0xff] %vm431_vm3, %v423_v18  ;;  %433 = vst.msk [vmem:[%s262_s9 + $0x8] sm:$0xff] %vm431_vm3, %v424_v19 }
 0x1be   : > { %434 = vst.msk [vmem:[%s262_s9 + $0x10] sm:$0xff] %vm431_vm3, %v425_v20  ;;  %435 = vst.msk [vmem:[%s262_s9 + $0x18] sm:$0xff] %vm431_vm3, %v426_v21 }
 0x1bf   : > { %436 = vst.msk [vmem:[%s262_s9 + $0x20] sm:$0xff] %vm431_vm3, %v427_v23  ;;  %437 = vst.msk [vmem:[%s262_s9 + $0x28] sm:$0xff] %vm431_vm3, %v428_v24 }
 0x1c0   : > { %438 = vst.msk [vmem:[%s262_s9 + $0x30] sm:$0xff] %vm431_vm3, %v429_v25  ;;  %439 = vst.msk [vmem:[%s262_s9 + $0x38] sm:$0xff] %vm431_vm3, %v430_v26 }
 0x1c1 PF: > { %s14_s17 = sadd.s32 1, %s637_s17   ;;  %s725_s15 = smov %s633_s16 }
 0x1c2   : > { %p11_p5 = scmp.ge.s32.totalorder %s14_s17, 4   ;;  %s726_s16 = smov %s728_s18 }
 0x1c4   :  { %13 = sbr.rel (!%p11_p5) target bundleno = 2 (0x2), region = 72 }

</bundles_post_ra>
